<compile_context>
chip_gen: v7x
topology: tpu7x:2x2x1
jax: 0.10.0
libtpu: 0.0.40
codegen_flags: <defaults>
</compile_context>

<pallas_src>
import functools

import jax
import jax.numpy as jnp
from jax.experimental import pallas as pl
from jax.experimental.pallas import tpu as pltpu


def _mae_mse_kernel(imgs_ref, pred_ref, mask_ref, out_ref, acc_ref, *,
                    tm, total_rows, blocks_per_part, scale, need_row_mask):
    part = pl.program_id(0)   # "parallel" axis (dual-TC on v7x)
    j = pl.program_id(1)      # "arbitrary" reduction axis over row tiles

    @pl.when(j == 0)
    def _():
        acc_ref[...] = jnp.zeros_like(acc_ref)

    diff = pred_ref[...].astype(jnp.float32) - imgs_ref[...].astype(jnp.float32)
    m = mask_ref[...].astype(jnp.float32)                 # (tm, 1)
    contrib = diff * diff * m                             # (tm, D)

    if need_row_mask:
        # Un-clamped global block index -> row-validity mask.  Handles both
        # the ragged last tile and fully-duplicated pad steps of the parallel
        # split.  Applied to the final product so padded-garbage (possibly
        # NaN) rows cannot leak into the sum.
        blk = part * blocks_per_part + j
        row0 = blk * tm
        row_ids = jax.lax.broadcasted_iota(jnp.int32, (tm, 1), 0) + row0
        valid = row_ids < total_rows                      # (tm, 1) bool
        contrib = jnp.where(valid, contrib, 0.0)

    # Keep lanes live: reduce only over rows each step; the expensive
    # cross-lane reduce happens once in the epilogue below.
    acc_ref[...] += jnp.sum(contrib, axis=0, keepdims=True)   # (1, D)

    @pl.when(j == pl.num_programs(1) - 1)
    def _():
        total = jnp.sum(acc_ref[...], axis=1, keepdims=True) * scale   # (1, 1)
        out_ref[...] = total.reshape(1, 1, 1)


def mae_mse_loss(imgs, pred, mask, *, mask_ratio, tm=1024):
    """imgs/pred: [N, L, D]; mask: [N, L]. Returns dict with scalar loss."""
    N, L, D = pred.shape
    NL = N * L

    imgs2 = imgs.reshape(NL, D)
    pred2 = pred.reshape(NL, D)
    mask2 = mask.reshape(NL, 1)

    # Keep double-buffered inputs comfortably inside the default 32 MiB scoped
    # VMEM (2 big inputs x 2 buffers x tm x D x 4B); matters most on v7x
    # (64 MiB physical VMEM).
    max_tm = max(8, ((24 * 1024 * 1024) // (16 * D)) // 8 * 8)
    tm = min(tm, max_tm)
    if NL <= tm:
        tm = NL                       # full-extent block (always legal)
    else:
        tm = max(8, (tm // 8) * 8)    # sublane (8) alignment for tiled blocks

    num_blocks = -(-NL // tm)
    num_parts = 2 if num_blocks >= 2 else 1      # dual-TC split on v7x
    bpp = -(-num_blocks // num_parts)            # blocks per part
    need_row_mask = (NL % tm != 0) or (num_parts * bpp != num_blocks)

    def row_block(i, j):
        # Clamp so duplicated pad steps still DMA an in-bounds block; the
        # in-kernel validity mask zeroes their contribution.
        return (jnp.minimum(i * bpp + j, num_blocks - 1), 0)

    kernel = functools.partial(
        _mae_mse_kernel,
        tm=tm,
        total_rows=NL,
        blocks_per_part=bpp,
        scale=1.0 / (float(N * L * D) * float(mask_ratio)),
        need_row_mask=need_row_mask,
    )

    itemsize = jnp.dtype(pred.dtype).itemsize
    cost = pl.CostEstimate(
        flops=4 * NL * D,               # sub, sq, mask-mul, accumulate
        transcendentals=0,
        bytes_accessed=(imgs2.size + pred2.size) * itemsize
        + mask2.size * jnp.dtype(mask.dtype).itemsize
        + num_parts * 4,
    )

    partials = pl.pallas_call(
        kernel,
        out_shape=jax.ShapeDtypeStruct((num_parts, 1, 1), jnp.float32),
        grid_spec=pltpu.PrefetchScalarGridSpec(
            num_scalar_prefetch=0,
            grid=(num_parts, bpp),
            in_specs=[
                pl.BlockSpec((tm, D), row_block),   # imgs
                pl.BlockSpec((tm, D), row_block),   # pred
                pl.BlockSpec((tm, 1), row_block),   # mask
            ],
            out_specs=pl.BlockSpec((1, 1, 1), lambda i, j: (i, 0, 0)),
            scratch_shapes=[pltpu.VMEM((1, D), jnp.float32)],
        ),
        compiler_params=pltpu.CompilerParams(
            dimension_semantics=("parallel", "arbitrary"),
        ),
        cost_estimate=cost,
    )(imgs2, pred2, mask2)

    return {"mae_mse_loss": jnp.sum(partials)}


def _ref_loss(imgs, pred, mask, mask_ratio):
    d = pred.astype(jnp.float32) - imgs.astype(jnp.float32)
    return jnp.mean(d * d * mask.astype(jnp.float32)[..., None]) / mask_ratio


if __name__ == "__main__":
    mask_ratio = 0.75
    key = jax.random.PRNGKey(0)

    # Case 1: small single-tile case (N=2, p=4 patches on 16x16 -> L=16, D=48).
    N, L, D = 2, 16, 48
    k1, k2, k3, key = jax.random.split(key, 4)
    imgs = jax.random.normal(k1, (N, L, D), dtype=jnp.float32)
    pred = jax.random.normal(k2, (N, L, D), dtype=jnp.float32)
    mask = (jax.random.uniform(k3, (N, L)) < mask_ratio).astype(jnp.float32)

    out = mae_mse_loss(imgs, pred, mask, mask_ratio=mask_ratio)
    loss = jax.block_until_ready(out["mae_mse_loss"])
    ref = _ref_loss(imgs, pred, mask, mask_ratio)
    assert jnp.allclose(loss, ref, rtol=1e-5, atol=1e-6), (loss, ref)

    # Case 2: multi-tile + dual-part + ragged-tail path (tm=8, NL=30).
    N2, L2 = 2, 15
    k1, k2, k3, key = jax.random.split(key, 4)
    imgs2 = jax.random.normal(k1, (N2, L2, D), dtype=jnp.float32)
    pred2 = jax.random.normal(k2, (N2, L2, D), dtype=jnp.float32)
    mask2 = (jax.random.uniform(k3, (N2, L2)) < mask_ratio).astype(jnp.float32)

    out2 = mae_mse_loss(imgs2, pred2, mask2, mask_ratio=mask_ratio, tm=8)
    loss2 = jax.block_until_ready(out2["mae_mse_loss"])
    ref2 = _ref_loss(imgs2, pred2, mask2, mask_ratio)
    assert jnp.allclose(loss2, ref2, rtol=1e-5, atol=1e-6), (loss2, ref2)

    # Case 3: evenly-divisible multi-tile path (no row mask emitted) + bf16.
    N3, L3 = 4, 8                      # NL = 32, tm = 8 -> 4 blocks, 2 parts
    k1, k2, k3, key = jax.random.split(key, 4)
    imgs3 = jax.random.normal(k1, (N3, L3, D), dtype=jnp.bfloat16)
    pred3 = jax.random.normal(k2, (N3, L3, D), dtype=jnp.bfloat16)
    mask3 = (jax.random.uniform(k3, (N3, L3)) < mask_ratio).astype(jnp.bfloat16)

    out3 = mae_mse_loss(imgs3, pred3, mask3, mask_ratio=mask_ratio, tm=8)
    loss3 = jax.block_until_ready(out3["mae_mse_loss"])
    ref3 = _ref_loss(imgs3, pred3, mask3, mask_ratio)
    assert jnp.allclose(loss3, ref3, rtol=2e-2, atol=1e-3), (loss3, ref3)

    print("KERNEL_OK")
</pallas_src>

<mosaic_0001>
module attributes {stable_mosaic.version = 11 : i64} {
  func.func @_mae_mse_kernel(%arg0: i32, %arg1: i32, %arg2: memref<32x48xf32, #tpu.memory_space<vmem>>, %arg3: memref<32x48xf32, #tpu.memory_space<vmem>>, %arg4: memref<32x1xf32, #tpu.memory_space<vmem>>, %arg5: memref<1x1x1xf32, #tpu.memory_space<vmem>>, %arg6: memref<1x48xf32, #tpu.memory_space<vmem>>) attributes {dimension_semantics = [#tpu.dimension_semantics<parallel>, #tpu.dimension_semantics<arbitrary>], iteration_bounds = array<i64: 1, 1>, scalar_prefetch = 0 : i64, scratch_operands = 1 : i64, tpu.core_type = #tpu.core_type<tc>, window_params = [{transform_indices = @transform_0, window_bounds = array<i64: 32, 48>}, {transform_indices = @transform_1, window_bounds = array<i64: 32, 48>}, {transform_indices = @transform_2, window_bounds = array<i64: 32, 1>}, {transform_indices = @transform_3, window_bounds = array<i64: 1, 1, 1>}]} {
    %c0_i32 = arith.constant 0 : i32
    %0 = arith.cmpi eq, %arg1, %c0_i32 : i32
    %1 = arith.extui %0 : i1 to i32
    %c0_i32_0 = arith.constant 0 : i32
    %2 = arith.cmpi ne, %1, %c0_i32_0 : i32
    scf.if %2 {
      %cst_12 = arith.constant 0.000000e+00 : f32
      %18 = vector.broadcast %cst_12 : f32 to vector<1x48xf32>
      %c0_13 = arith.constant 0 : index
      %c0_14 = arith.constant 0 : index
      %19 = vector.load %arg6[%c0_13, %c0_14] : memref<1x48xf32, #tpu.memory_space<vmem>>, vector<1x48xf32>
      tpu.vector_store %arg6[%c0_13, %c0_14], %18 {strides = array<i32>} : memref<1x48xf32, #tpu.memory_space<vmem>>, vector<1x48xf32>,
    } else {
    }
    %c0 = arith.constant 0 : index
    %c0_1 = arith.constant 0 : index
    %3 = vector.load %arg3[%c0, %c0_1] : memref<32x48xf32, #tpu.memory_space<vmem>>, vector<32x48xf32>
    %c0_2 = arith.constant 0 : index
    %c0_3 = arith.constant 0 : index
    %4 = vector.load %arg2[%c0_2, %c0_3] : memref<32x48xf32, #tpu.memory_space<vmem>>, vector<32x48xf32>
    %5 = arith.subf %3, %4 : vector<32x48xf32>
    %c0_4 = arith.constant 0 : index
    %c0_5 = arith.constant 0 : index
    %6 = vector.load %arg4[%c0_4, %c0_5] : memref<32x1xf32, #tpu.memory_space<vmem>>, vector<32x1xf32>
    %7 = arith.mulf %5, %5 : vector<32x48xf32>
    %8 = vector.broadcast %6 : vector<32x1xf32> to vector<32x48xf32>
    %9 = arith.mulf %7, %8 : vector<32x48xf32>
    %c0_6 = arith.constant 0 : index
    %c0_7 = arith.constant 0 : index
    %10 = vector.load %arg6[%c0_6, %c0_7] : memref<1x48xf32, #tpu.memory_space<vmem>>, vector<1x48xf32>
    %cst = arith.constant dense<0.000000e+00> : vector<48xf32>
    %11 = vector.multi_reduction <add>, %9, %cst [0] : vector<32x48xf32> to vector<48xf32>
    %12 = vector.shape_cast %11 : vector<48xf32> to vector<1x48xf32>
    %13 = arith.addf %10, %12 : vector<1x48xf32>
    %c0_8 = arith.constant 0 : index
    %c0_9 = arith.constant 0 : index
    %14 = vector.load %arg6[%c0_8, %c0_9] : memref<1x48xf32, #tpu.memory_space<vmem>>, vector<1x48xf32>
    tpu.vector_store %arg6[%c0_8, %c0_9], %13 {strides = array<i32>} : memref<1x48xf32, #tpu.memory_space<vmem>>, vector<1x48xf32>,
    %c0_i32_10 = arith.constant 0 : i32
    %15 = arith.cmpi eq, %arg1, %c0_i32_10 : i32
    %16 = arith.extui %15 : i1 to i32
    %c0_i32_11 = arith.constant 0 : i32
    %17 = arith.cmpi ne, %16, %c0_i32_11 : i32
    scf.if %17 {
      %c0_12 = arith.constant 0 : index
      %c0_13 = arith.constant 0 : index
      %18 = vector.load %arg6[%c0_12, %c0_13] : memref<1x48xf32, #tpu.memory_space<vmem>>, vector<1x48xf32>
      %cst_14 = arith.constant dense<0.000000e+00> : vector<1xf32>
      %19 = vector.multi_reduction <add>, %18, %cst_14 [1] : vector<1x48xf32> to vector<1xf32>
      %20 = vector.shape_cast %19 : vector<1xf32> to vector<1x1xf32>
      %cst_15 = arith.constant 8.68055562E-4 : f32
      %21 = vector.broadcast %cst_15 : f32 to vector<1x1xf32>
      %22 = arith.mulf %20, %21 : vector<1x1xf32>
      %23 = vector.shape_cast %22 : vector<1x1xf32> to vector<1x1x1xf32>
      %c0_16 = arith.constant 0 : index
      %c0_17 = arith.constant 0 : index
      %c0_18 = arith.constant 0 : index
      %24 = vector.load %arg5[%c0_16, %c0_17, %c0_18] : memref<1x1x1xf32, #tpu.memory_space<vmem>>, vector<1x1x1xf32>
      tpu.vector_store %arg5[%c0_16, %c0_17, %c0_18], %23 {strides = array<i32>} : memref<1x1x1xf32, #tpu.memory_space<vmem>>, vector<1x1x1xf32>,
    } else {
    }
    return
  }
  func.func @transform_0(%arg0: i32, %arg1: i32) -> (i32, i32) {
    %c1_i32 = arith.constant 1 : i32
    %0 = arith.muli %arg0, %c1_i32 : i32
    %1 = arith.addi %0, %arg1 : i32
    %c0_i32 = arith.constant 0 : i32
    %2 = arith.minsi %1, %c0_i32 : i32
    %c0_i32_0 = arith.constant 0 : i32
    %c0_i32_1 = arith.constant 0 : i32
    return %2, %c0_i32_0 : i32, i32
  }
  func.func @transform_1(%arg0: i32, %arg1: i32) -> (i32, i32) {
    %c1_i32 = arith.constant 1 : i32
    %0 = arith.muli %arg0, %c1_i32 : i32
    %1 = arith.addi %0, %arg1 : i32
    %c0_i32 = arith.constant 0 : i32
    %2 = arith.minsi %1, %c0_i32 : i32
    %c0_i32_0 = arith.constant 0 : i32
    %c0_i32_1 = arith.constant 0 : i32
    return %2, %c0_i32_0 : i32, i32
  }
  func.func @transform_2(%arg0: i32, %arg1: i32) -> (i32, i32) {
    %c1_i32 = arith.constant 1 : i32
    %0 = arith.muli %arg0, %c1_i32 : i32
    %1 = arith.addi %0, %arg1 : i32
    %c0_i32 = arith.constant 0 : i32
    %2 = arith.minsi %1, %c0_i32 : i32
    %c0_i32_0 = arith.constant 0 : i32
    %c0_i32_1 = arith.constant 0 : i32
    return %2, %c0_i32_0 : i32, i32
  }
  func.func @transform_3(%arg0: i32, %arg1: i32) -> (i32, i32, i32) {
    %c0_i32 = arith.constant 0 : i32
    %c0_i32_0 = arith.constant 0 : i32
    %c0_i32_1 = arith.constant 0 : i32
    return %arg0, %c0_i32, %c0_i32_0 : i32, i32, i32
  }
}

</mosaic_0001>

<bundles_post_ra>
// kernel: tpu_custom_call.1
= control target key start
LH: loop header
LB: loop body
LE: loop exit
PB: predicated region body
PF: predicated region fallthrough
CT: control target
= control target key end

     0   :  { %8 = vsyncpa [#allocation4], 0  ;;  %s343_s0 = inlined_call_operand.vmem [shape: f32[32,48], index: 0, kind: input, shape index: {}]   ;;  %s344_s1 = inlined_call_operand.hbm [shape: f32[32,48], index: 1, kind: input, shape index: {}]   ;;  %s345_s2 = inlined_call_operand.vmem [shape: f32[32,1], index: 2, kind: input, shape index: {}]   ;;  %s346_s3 = inlined_call_operand.hbm [shape: f32[1,1,1], index: 3, kind: output, shape index: {}]  }
   0x1   :  { %9 = vsyncpa [#allocation5], 0  ;;  %s266_s12 = smov [#allocation3]   ;;  %s218_s16 = scalar_lea.hbm %s344_s1, 512 }
   0x2   :  { %s35_s13 = sshll.u32 %s266_s12, 4  ;;  %p219_p0 = scmp.ne.s32.totalorder %s344_s1, %s218_s16  ;;  %s36_s13 = int_to_ptr.vmem [resolvable:$true] %s35_s13 }
   0x3   :  { %p222_p1 = scmp.lt.u32.totalorder %s218_s16, %s344_s1 }
   0x5   :  { %p224_p2 = pnand %p222_p1, %p219_p0 }
   0x7   :  { %227 = shalt.err (!%p224_p2)
}
   0x8   :  { %s228_s21 = scalar_lea.vmem %s36_s13, 512  ;;  %p233_p4 = scmp.lt.s32.totalorder %s36_s13, %s36_s13 }
   0x9   :  { %p229_p3 = scmp.ne.s32.totalorder %s36_s13, %s228_s21  ;;  %p234_p5 = scmp.lt.s32.totalorder %s228_s21, %s228_s21 }
   0xb   :  { %p235_p6 = por %p234_p5, %p233_p4 }
   0xd   :  { %p236_p7 = pnand %p235_p6, %p229_p3 }
   0xf   :  { %239 = shalt.err (!%p236_p7)
}
  0x10   :  { %s267_s22 = smov 128   ;;  %s268_s23 = smov 8  }
  0x11   :  { %41 = dma.hbm_to_vmem [thread:$0]  %s344_s1, 512, %s36_s13, [#allocation4], %s267_s22, %s267_s22, %s268_s23  }
  0x12   :  { %262 = dma.done.wait [#allocation4], 512  }
  0x13   :  { %263 = vsyncadd [#allocation4], 4294966784  ;;  %v269_v0 = vmov 0   ;;  %v123_v1 = vld [vmem:[%s345_s2 + $0x10] sm:$0xff]  ;;  %v121_v2 = vld [vmem:[%s345_s2] sm:$0xff]  ;;  %vm107_vm0 = vcmask 385024  }
  0x14   :  { %217 = vset.pattern.permute.xlu1 %v269_v0  ;;  %216 = vset.pattern.permute.xlu0 %v269_v0  ;;  %v124_v3 = vld [vmem:[%s345_s2 + $0x18] sm:$0xff]  ;;  %v122_v4 = vld [vmem:[%s345_s2 + $0x8] sm:$0xff]  ;;  %v270_v5 = vmov 0.0   ;;  %v113_v7 = vld [vmem:[%s343_s0] sm:$0xff]  ;;  %vm154_vm1 = vcmask 392192   ;;  %vm179_vm2 = vcmask 0  }
  0x15   :  { %141 = vperm.xlu1 %217, %v123_v1   ;;  %131 = vperm.xlu0 %216, %v121_v2   ;;  %108 = vst.msk [vmem:[#allocation2] sm:$0x1] %vm107_vm0, %v270_v5  ;;  %v109_v6 = vld [vmem:[#allocation3] sm:$0xff]  ;;  %v111_v8 = vld [vmem:[#allocation3 + $0x10] sm:$0xff]  ;;  %v110_v10 = vld [vmem:[#allocation3 + $0x8] sm:$0xff] }
  0x16   :  { %v115_v9 = vld [vmem:[%s343_s0 + $0x10] sm:$0xff]  ;;  %v114_v11 = vld [vmem:[%s343_s0 + $0x8] sm:$0xff]  ;;  %v117_v12 = vsub.f32 %v109_v6, %v113_v7  ;;  %v112_v13 = vld [vmem:[#allocation3 + $0x18] sm:$0xff] }
  0x17   :  { %v116_v14 = vld [vmem:[%s343_s0 + $0x18] sm:$0xff]  ;;  %v119_v15 = vsub.f32 %v111_v8, %v115_v9  ;;  %v118_v16 = vsub.f32 %v110_v10, %v114_v11  ;;  %s271_s0 = smov [#allocation6]  }
  0x18   :  { %v125_v17 = vmul.f32 %v117_v12, %v117_v12  ;;  %v120_v18 = vsub.f32 %v112_v13, %v116_v14  ;;  %s187_s13 = sshll.u32 %s271_s0, 4  ;;  %s188_s13 = int_to_ptr.vmem [resolvable:$true] %s187_s13 }
  0x19   :  { %146 = vperm.xlu1 %217, %v124_v3   ;;  %136 = vperm.xlu0 %216, %v122_v4   ;;  %v127_v21 = vmul.f32 %v119_v15, %v119_v15  ;;  %v126_v22 = vmul.f32 %v118_v16, %v118_v16  ;;  %s240_s14 = scalar_lea.vmem %s188_s13, 16  ;;  %s244_s15 = scalar_lea.vmem %s188_s13, 32 }
  0x1a   :  { %v128_v24 = vmul.f32 %v120_v18, %v120_v18  ;;  %p241_p8 = scmp.ne.s32.totalorder %s188_s13, %s240_s14  ;;  %p245_p9 = scmp.lt.s32.totalorder %s188_s13, %s188_s13 }
  0x1b   :  { %p246_p10 = scmp.lt.s32.totalorder %s244_s15, %s240_s14 }
  0x1c   :  { %v153_v42 = vld [vmem:[#allocation2] sm:$0x1] }
  0x1d   :  { %p247_p11 = por %p246_p10, %p245_p9 }
  0x1f   :  { %p248_p12 = pnand %p247_p11, %p241_p8 }
  0x94   :  { %v142_v19 = vpop.permute.xlu1 %141  ;;  %v132_v20 = vpop.permute.xlu0 %131 }
  0x95   :  { %v149_v23 = vmul.f32 %v132_v20, %v125_v17  ;;  %v151_v27 = vmul.f32 %v142_v19, %v127_v21 }
  0x97   :  { %v155_v29 = vsel %vm154_vm1, %v149_v23, 0.0  ;;  %v158_v33 = vsel %vm154_vm1, %v151_v27, 0.0 }
  0x98   :  { %v147_v25 = vpop.permute.xlu1 %146  ;;  %v137_v26 = vpop.permute.xlu0 %136 }
  0x99   :  { %v150_v28 = vmul.f32 %v137_v26, %v126_v22  ;;  %v152_v30 = vmul.f32 %v147_v25, %v128_v24 }
  0x9b   :  { %v156_v31 = vsel %vm154_vm1, %v150_v28, 0.0  ;;  %v160_v35 = vsel %vm154_vm1, %v152_v30, 0.0 }
  0x9c   :  { %v157_v32 = vadd.f32 %v156_v31, %v155_v29 }
  0x9e   :  { %v159_v34 = vadd.f32 %v158_v33, %v157_v32 }
  0xa0   :  { %v161_v36 = vadd.f32 %v160_v35, %v159_v34 }
  0xa2   :  { %v162_v37 = vrot.slane %v161_v36, 4 }
  0xa4   :  { %v163_v38 = vadd.f32 %v162_v37, %v161_v36 }
  0xa6   :  { %v164_v39 = vrot.slane %v163_v38, 2 }
  0xa8   :  { %v165_v40 = vadd.f32 %v164_v39, %v163_v38 }
  0xaa   :  { %v166_v41 = vrot.slane %v165_v40, 1 }
  0xac   :  { %v167_v43 = vadd.f32 %v166_v41, %v165_v40 }
  0xae   :  { %v168_v44 = vadd.f32 %v167_v43, %v153_v42 }
  0xb0   :  { %170 = vst.msk [vmem:[#allocation2] sm:$0x1] %vm107_vm0, %v168_v44 }
  0xb7   :  { %v174_v45 = vld [vmem:[#allocation2] sm:$0x1] }
  0xb8   :  { %v175_v46 = vsel %vm107_vm0, %v174_v45, 0.0 }
  0xb9   :  { %176 = vadd.xlane.f32.xlu0 %v175_v46 }
 0x146   :  { %v177_v47 = vpop.xlane.xlu0 %176 }
 0x147   :  { %v178_v48 = vmul.f32 0.00086805556, %v177_v47 }
 0x149   :  { %180 = vst.msk [vmem:[#allocation6] sm:$0x1] %vm179_vm2, %v178_v48 }
 0x14a   :  { %251 = shalt.err (!%p248_p12)
}
 0x14b   :  { %s252_s18 = scalar_lea.hbm %s346_s3, 16 }
 0x14c   :  { %p253_p13 = scmp.ne.s32.totalorder %s346_s3, %s252_s18  ;;  %p256_p0 = scmp.lt.u32.totalorder %s252_s18, %s346_s3 }
 0x14e   :  { %p258_p1 = pnand %p256_p0, %p253_p13 }
 0x150   :  { %261 = shalt.err (!%p258_p1)
}
 0x151   :  { %190 = dma.vmem_to_hbm [thread:$0]  %s188_s13, 16, %s346_s3, [#allocation5]  }
 0x152   :  { %264 = dma.done.wait [#allocation5], 16  }
 0x153   :  { %265 = vsyncadd [#allocation5], 4294967280 }
 0x154   :  { %194 = vsyncpa [#allocation4], 1 }
 0x155   :  { %195 = vsyncpa [#allocation5], 1 }

</bundles_post_ra>
